<compile_context>
chip_gen: v7x
topology: tpu7x:2x2x1
jax: 0.10.0
libtpu: 0.0.40
codegen_flags: <defaults>
</compile_context>

<pallas_src>
import jax
import jax.numpy as jnp
from jax.experimental import pallas as pl
from jax.experimental.pallas import tpu as pltpu


def nsgt_matmul_kernel(x_ref, w_ref, o_ref):
    """Fused complex analysis matmul (single MXU dot, lane-dense store).

    x_ref : (Npad, L)      flattened (padded) waveforms, bf16
    w_ref : (L, TM)        current tile of fused [real | imag] atoms, bf16
    o_ref : (Npad, TM)     f32 coefficients for this tile
    """
    o_ref[...] = jnp.dot(
        x_ref[...], w_ref[...], preferred_element_type=jnp.float32)


def make_analysis_bank(L, F1, F2, T, dtype=jnp.float32):
    """Deterministic Hann-windowed complex-exponential filterbank.

    Returns (wr, wi) each of shape (L, F1*F2*T), columns ordered row-major
    over (f1, f2, frame).
    """
    n = jnp.arange(L, dtype=jnp.float32)
    f1_idx = jnp.arange(F1, dtype=jnp.float32)
    f2_idx = jnp.arange(F2, dtype=jnp.float32)
    t_idx = jnp.arange(T, dtype=jnp.float32)

    # normalized frequencies in (0, 0.5), one per (f1, f2) bin
    freqs = ((f1_idx[:, None] * F2 + f2_idx[None, :]) + 1.0) / (F1 * F2 + 1.0) * 0.5

    hop = L / T
    centers = t_idx * hop + hop / 2.0                       # (T,)
    win_len = 2.0 * hop

    # circular (wrap-around) distance of each sample to each frame center
    dist = jnp.abs(((n[None, :] - centers[:, None] + L / 2.0) % L) - L / 2.0)  # (T, L)
    win = jnp.where(dist < win_len / 2.0,
                    0.5 * (1.0 + jnp.cos(2.0 * jnp.pi * dist / win_len)),
                    0.0)                                    # (T, L)

    phase = 2.0 * jnp.pi * freqs[:, :, None, None] * n[None, None, None, :]   # (F1,F2,1,L)
    atoms_re = win[None, None, :, :] * jnp.cos(phase)       # (F1, F2, T, L)
    atoms_im = -win[None, None, :, :] * jnp.sin(phase)      # (F1, F2, T, L)

    M = F1 * F2 * T
    wr = atoms_re.reshape(M, L).T.astype(dtype)             # (L, M)
    wi = atoms_im.reshape(M, L).T.astype(dtype)             # (L, M)
    return wr, wi


def _vmem_capacity_bytes(default=64 * 1024 * 1024):
    try:
        info = pltpu.get_tpu_info()
        return int(getattr(info, "vmem_capacity_bytes", default))
    except Exception:
        return default


def _pick_tile_m(M2, Npad, L, budget):
    """Largest bin-tile (multiple of 128 dividing M2) that fits `budget`
    while keeping >= 2 grid steps when possible (v7x megacore sharding)."""
    best = None
    t = 128
    while t <= M2:
        if M2 % t == 0:
            footprint = (2 * L * t * 2         # fused weight tile, 2 buffers, bf16
                         + 2 * Npad * t * 4    # output tile, 2 buffers, f32
                         + 2 * Npad * L * 2)   # x block (resident), bf16
            steps = M2 // t
            if footprint <= budget:
                if steps >= 2:
                    best = t
                elif best is None:
                    best = t
        t += 128
    return 128 if best is None else best


def nsgt_sl_forward(x, wr, wi, F1, F2, T, tile_m=None):
    """NSGT_SL.forward equivalent.

    x : (nb_samples, nb_channels, nb_timesteps) float32
    returns: (nb_samples, nb_channels, F1, F2, T, 2) float32
    """
    S, C, L = x.shape
    N = S * C
    M = F1 * F2 * T
    M2 = 2 * M
    assert M2 % 128 == 0, "fused bin axis must be a multiple of 128"
    assert L % 128 == 0, "timestep axis must be a multiple of 128"

    # pad batch axis to a sublane-dense multiple of 8
    Npad = max(8, ((N + 7) // 8) * 8)

    # fused [real | imag] analysis bank, streamed in bf16 (HBM-bound kernel)
    W = jnp.concatenate([wr, wi], axis=1).astype(jnp.bfloat16)  # (L, 2M)

    xf = x.reshape(N, L).astype(jnp.bfloat16)                   # x.view(-1, L)
    if Npad != N:
        xf = jnp.pad(xf, ((0, Npad - N), (0, 0)))

    vmem_cap = _vmem_capacity_bytes()
    vmem_limit = min(vmem_cap // 2, 64 * 1024 * 1024)
    if tile_m is None:
        tile_m = _pick_tile_m(M2, Npad, L, vmem_limit - 2 * 1024 * 1024)
    assert M2 % tile_m == 0

    cost = pl.CostEstimate(
        flops=2 * Npad * L * M2,
        transcendentals=0,
        bytes_accessed=L * M2 * 2 + Npad * L * 2 + Npad * M2 * 4,
    )

    out = pl.pallas_call(
        nsgt_matmul_kernel,
        out_shape=jax.ShapeDtypeStruct((Npad, M2), jnp.float32),
        grid_spec=pltpu.PrefetchScalarGridSpec(
            num_scalar_prefetch=0,
            grid=(M2 // tile_m,),
            in_specs=[
                pl.BlockSpec((Npad, L), lambda j: (0, 0)),
                pl.BlockSpec((L, tile_m), lambda j: (0, j)),
            ],
            out_specs=pl.BlockSpec((Npad, tile_m), lambda j: (0, j)),
        ),
        compiler_params=pltpu.CompilerParams(
            dimension_semantics=("parallel",),
            vmem_limit_bytes=vmem_limit,
        ),
        cost_estimate=cost,
    )(xf, W)

    out = out[:N]                                   # drop padded batch rows
    cr = out[:, :M].reshape(S, C, F1, F2, T)        # real part, (f1, f2, frame)
    ci = out[:, M:].reshape(S, C, F1, F2, T)        # imag part
    # torch.view_as_real convention: last axis = (real, imag)
    return jnp.stack([cr, ci], axis=-1)


def nsgt_sl_reference(x, wr, wi, F1, F2, T):
    """Pure-JAX reference using the same bf16-cast operands (f32 accumulate)."""
    S, C, L = x.shape
    M = F1 * F2 * T
    xf = x.reshape(S * C, L).astype(jnp.bfloat16).astype(jnp.float32)
    W = jnp.concatenate([wr, wi], axis=1).astype(jnp.bfloat16).astype(jnp.float32)
    out = jnp.dot(xf, W, precision=jax.lax.Precision.HIGHEST)
    cr = out[:, :M].reshape(S, C, F1, F2, T)
    ci = out[:, M:].reshape(S, C, F1, F2, T)
    return jnp.stack([cr, ci], axis=-1)


if __name__ == "__main__":
    # small but tile-friendly shapes
    nb_samples, nb_channels, nb_timesteps = 2, 2, 512
    F1, F2, T = 4, 4, 16  # nb_bins_1, nb_bins_2, nb_frames -> M = 256, 2M = 512

    key = jax.random.PRNGKey(0)
    x = jax.random.normal(
        key, (nb_samples, nb_channels, nb_timesteps), dtype=jnp.float32)

    wr, wi = make_analysis_bank(nb_timesteps, F1, F2, T)

    y = nsgt_sl_forward(x, wr, wi, F1, F2, T)
    y = jax.block_until_ready(y)

    assert y.shape == (nb_samples, nb_channels, F1, F2, T, 2), y.shape

    y_ref = nsgt_sl_reference(x, wr, wi, F1, F2, T)
    assert jnp.allclose(y, y_ref, atol=1e-3, rtol=1e-3), "mismatch vs reference"

    print("KERNEL_OK")
</pallas_src>

<mosaic_0001>
module attributes {stable_mosaic.version = 11 : i64} {
  func.func @nsgt_matmul_kernel(%arg0: i32, %arg1: memref<8x512xbf16, #tpu.memory_space<vmem>>, %arg2: memref<512x256xbf16, #tpu.memory_space<vmem>>, %arg3: memref<8x256xf32, #tpu.memory_space<vmem>>) attributes {dimension_semantics = [#tpu.dimension_semantics<parallel>], iteration_bounds = array<i64: 2>, scalar_prefetch = 0 : i64, scratch_operands = 0 : i64, tpu.core_type = #tpu.core_type<tc>, window_params = [{pipeline_mode = #tpu.pipeline_mode<synchronous>, transform_indices = @transform_0, window_bounds = array<i64: 8, 512>}, {transform_indices = @transform_1, window_bounds = array<i64: 512, 256>}, {transform_indices = @transform_2, window_bounds = array<i64: 8, 256>}]} {
    %c0 = arith.constant 0 : index
    %c0_0 = arith.constant 0 : index
    %0 = vector.load %arg1[%c0, %c0_0] : memref<8x512xbf16, #tpu.memory_space<vmem>>, vector<8x512xbf16>
    %c0_1 = arith.constant 0 : index
    %c0_2 = arith.constant 0 : index
    %1 = vector.load %arg2[%c0_1, %c0_2] : memref<512x256xbf16, #tpu.memory_space<vmem>>, vector<512x256xbf16>
    %cst = arith.constant dense<0.000000e+00> : vector<8x256xf32>
    %2 = tpu.matmul %0, %1, %cst {dimension_numbers = #tpu.dot_dimension_numbers<[1], [0], [0], [1], [0, 0, 1, 1], [], []>} : vector<8x512xbf16>, vector<512x256xbf16>, vector<8x256xf32> -> vector<8x256xf32>
    %c0_3 = arith.constant 0 : index
    %c0_4 = arith.constant 0 : index
    %3 = vector.load %arg3[%c0_3, %c0_4] : memref<8x256xf32, #tpu.memory_space<vmem>>, vector<8x256xf32>
    tpu.vector_store %arg3[%c0_3, %c0_4], %2 {strides = array<i32>} : memref<8x256xf32, #tpu.memory_space<vmem>>, vector<8x256xf32>,
    return
  }
  func.func @transform_0(%arg0: i32) -> (i32, i32) {
    %c0_i32 = arith.constant 0 : i32
    %c0_i32_0 = arith.constant 0 : i32
    %c0_i32_1 = arith.constant 0 : i32
    return %c0_i32, %c0_i32_0 : i32, i32
  }
  func.func @transform_1(%arg0: i32) -> (i32, i32) {
    %c0_i32 = arith.constant 0 : i32
    %c0_i32_0 = arith.constant 0 : i32
    return %c0_i32, %arg0 : i32, i32
  }
  func.func @transform_2(%arg0: i32) -> (i32, i32) {
    %c0_i32 = arith.constant 0 : i32
    %c0_i32_0 = arith.constant 0 : i32
    return %c0_i32, %arg0 : i32, i32
  }
}

</mosaic_0001>

<bundles_post_ra>
// kernel: tpu_custom_call.1
= control target key start
LH: loop header
LB: loop body
LE: loop exit
PB: predicated region body
PF: predicated region fallthrough
CT: control target
= control target key end

     0   :  { %7 = vsyncpa [#allocation3], 0  ;;  %s1420_s0 = inlined_call_operand.hbm [shape: bf16[8,512], index: 0, kind: input, shape index: {}]   ;;  %s1421_s1 = inlined_call_operand.hbm [shape: bf16[512,512], index: 1, kind: input, shape index: {}]   ;;  %s1422_s2 = inlined_call_operand.hbm [shape: f32[8,512], index: 2, kind: output, shape index: {}]  }
   0x1   :  { %8 = vsyncpa [#allocation6], 0 }
   0x2   :  { %10 = vsyncpa [#allocation6 + $0x1], 0 }
   0x3   :  { %11 = vsyncpa [#allocation4], 0 }
   0x4   :  { %13 = vsyncpa [#allocation4 + $0x1], 0  ;;  %s1157_s9 = smov 0   ;;  %s1159_s10 = smov 0  }
   0x5   :  { %s1161_s11 = smov 0   ;;  %s1163_s12 = smov 0  }
   0x6 LB: > { %s1178_s13 = sadd.s32 4294967295, %s1134_s12   ;;  %s758_s14 = sadd.s32 4294967294, %s1134_s12   ;;  %s1134_s12 = sphi %s1163_s12, %s1447_s12   ;;  %s1130_s11 = sphi %s1161_s11, %s1446_s11   ;;  %s1126_s10 = sphi %s1159_s10, %s1445_s10   ;;  %s1122_s9 = sphi %s1157_s9, %s1444_s9  }
   0x7   : > { %s1182_s15 = sadd.s32 1, %s1134_s12   ;;  %s47_s16 = sadd.s32 1, %s1130_s11 }
   0x8   : > { %s44_s17 = ssub.s32 %s1134_s12, %s1182_s15  ;;  %p54_p0 = scmp.ne.s32.totalorder %s1130_s11, %s1126_s10 }
   0x9   : > { %p45_p1 = scmp.eq.s32.totalorder %s44_s17, 0  ;;  %p55_p2 = scmp.eq.s32.totalorder %s1134_s12, 0 }
   0xa   : > { %p60_p3 = scmp.ne.s32.totalorder %s1126_s10, %s1122_s9  ;;  %p1423_p4 = scmp.eq.s32.totalorder %s1178_s13, 0 }
   0xb   : > { %s1194_s18 = scalar_select %p45_p1, %s1130_s11, %s47_s16  }
   0xc   : > { %p1196_p5 = por %p55_p2, %p54_p0  ;;  %p1202_p6 = por %p1423_p4, %p60_p3 }
   0xd   : > { %p84_p7 = scmp.eq.s32.totalorder %s1178_s13, 1  ;;  %p90_p8 = scmp.eq.s32.totalorder %s758_s14, 1 }
   0xe   : > { %s1429_s20 = scalar_select %p1202_p6, 1, 0 }
   0xf   : > { %p759_p9 = scmp.ge.s32.totalorder %s1134_s12, 1  ;;  %p97_p10 = scmp.lt.s32.totalorder %s1134_s12, 3 }
  0x10   : > { %p1209_p11 = por %p84_p7, %p54_p0  ;;  %p1213_p12 = por %p90_p8, %p60_p3 }
  0x11   : > { %p1217_p13 = pnand %p759_p9, %p97_p10  ;;  %s1136_s24 = smov [#allocation2]  }
  0x12   : > { %s1430_s21 = scalar_select %p1209_p11, 1, 0 }
  0x13   : > { %s1431_s22 = scalar_select %p1213_p12, 1, 0 }
  0x14   : > { %s1432_s23 = scalar_select %p1217_p13, 1, 0 }
  0x15   : > { %p854_p2 = pneg %p1217_p13  ;;  %s110_s25 = sshll.u32 %s1136_s24, 4  ;;  %s111_s25 = int_to_ptr.vmem [resolvable:$true] %s110_s25 }
  0x16   : > { %p867_p4 = scmp.lt.s32.totalorder %s1134_s12, 2  ;;  %p1433_p0 = scmp.eq.s32.totalorder %s1178_s13, 0 }
  0x17   : > { %s121_s27 = sand.u32 1, %s1130_s11   ;;  %s1006_s4 = scalar_lea.hbm %s1420_s0, 256 }
  0x18   : > { %p1227_p7 = pnand %p854_p2, %p1433_p0  ;;  %p1234_p3 = pnand %p867_p4, %p1196_p5 }
  0x19   : > { %s762_s29 = sshll.u32 %s121_s27, 9  ;;  %p1007_p8 = scmp.ne.s32.totalorder %s1420_s0, %s1006_s4 }
  0x1a   : > { %s1435_s28 = scalar_select %p1234_p3, 1, 0 }
  0x1b   : > { %p1008_p9 = pneg %p1227_p7  ;;  %p1013_p4 = scmp.lt.u32.totalorder %s1006_s4, %s1420_s0 }
  0x1d   : > { %p1009_p10 = pnand %p1008_p9, %p1007_p8 }
  0x1f   : > { %p1010_p2 = pneg %p1009_p10 }
  0x21   : > { %p1015_p5 = pnand %p1013_p4, %p1010_p2 }
  0x23   : > { %1018 = shalt.err (!%p1015_p5)
}
  0x24   : > { %s1019_s14 = scalar_lea.vmem %s111_s25, 256  ;;  %p1027_p11 = scmp.lt.s32.totalorder %s111_s25, %s111_s25 }
  0x25   : > { %p1020_p0 = scmp.ne.s32.totalorder %s111_s25, %s1019_s14  ;;  %p1028_p6 = scmp.lt.s32.totalorder %s1019_s14, %s1019_s14 }
  0x27   : > { %p1022_p1 = pnand %p1020_p0, %p1008_p9  ;;  %p1029_p13 = por %p1028_p6, %p1027_p11 }
  0x29   : > { %p1023_p12 = pneg %p1022_p1 }
  0x2b   : > { %p1030_p3 = pnand %p1029_p13, %p1023_p12 }
  0x2d   : > { %1033 = shalt.err (!%p1030_p3)
}
  0x2e   : > { %857 = dma.hbm_to_vmem [thread:$0]  (!%p1227_p7), %s1420_s0, 256, %s111_s25, [#allocation3]  }
  0x2f   : > { %s842_s19 = sshll.u32 %s1134_s12, 7  ;;  %s125_s24 = scalar_lea.vmem [#allocation5], %s762_s29 }
  0x30   : > { %s132_s30 = sshll.u32 %s125_s24, 4  ;;  %s1258_s5 = scalar_lea.hbm %s1421_s1, %s842_s19  ;;  %s1260_s30 = int_to_ptr.vmem [resolvable:$true] %s132_s30 }
  0x31   : > { %s1262_s26 = scalar_lea.sflag [#allocation6], %s121_s27  ;;  %s1034_s6 = scalar_lea.hbm %s1258_s5, 8192 }
  0x32   : > { %p1035_p6 = scmp.ne.s32.totalorder %s1258_s5, %s1034_s6  ;;  %p1436_p11 = scmp.ne.s32.totalorder %s1435_s28, 0 }
  0x33   : > { %s1039_s7 = scalar_lea.hbm %s1421_s1, 16384  ;;  %p1040_p7 = scmp.lt.u32.totalorder %s1258_s5, %s1421_s1 }
  0x34   : > { %p1036_p12 = pneg %p1436_p11  ;;  %p1041_p3 = scmp.lt.u32.totalorder %s1039_s7, %s1034_s6 }
  0x35   : > { %p1043_p9 = scmp.lt.u32.totalorder %s1034_s6, %s1258_s5 }
  0x36   : > { %p1037_p13 = pnand %p1036_p12, %p1035_p6  ;;  %p1042_p8 = por %p1041_p3, %p1040_p7 }
  0x38   : > { %p1038_p1 = pneg %p1037_p13  ;;  %p1044_p10 = por %p1043_p9, %p1042_p8 }
  0x3a   : > { %p1045_p2 = pnand %p1044_p10, %p1038_p1 }
  0x3c   : > { %1048 = shalt.err (!%p1045_p2)
}
  0x3d   : > { %s1049_s27 = scalar_lea.vmem %s1260_s30, 8192  ;;  %s1137_s16 = smov [#allocation5]  }
  0x3e   : > { %p1050_p4 = scmp.ne.s32.totalorder %s1260_s30, %s1049_s27  ;;  %s1054_s17 = sshll.u32 %s1137_s16, 4  ;;  %s1055_s17 = int_to_ptr.vmem [resolvable:$false] %s1054_s17 }
  0x3f   : > { %s1056_s19 = scalar_lea.vmem %s1055_s17, 16384  ;;  %p1057_p6 = scmp.lt.s32.totalorder %s1260_s30, %s1055_s17 }
  0x40   : > { %p1052_p5 = pnand %p1050_p4, %p1036_p12  ;;  %p1058_p13 = scmp.lt.s32.totalorder %s1056_s19, %s1049_s27 }
  0x42   : > { %p1053_p0 = pneg %p1052_p5  ;;  %p1059_p7 = por %p1058_p13, %p1057_p6 }
  0x44   : > { %p1060_p3 = pnand %p1059_p7, %p1053_p0 }
  0x46   : > { %1063 = shalt.err (!%p1060_p3)
}
  0x47   : > { %s1138_s24 = smov 256   ;;  %s1139_s3 = smov 128  }
  0x48   : > { %s1140_s4 = smov 8   ;;  %p1437_p12 = scmp.ne.s32.totalorder %s1432_s23, 0 }
  0x49   : > { %861 = dma.hbm_to_vmem [thread:$0]  (!%p1436_p11), %s1258_s5, 8192, %s1260_s30, %s1262_s26, %s1138_s24, %s1139_s3, %s1140_s4  }
  0x4a   : > { %144 = sbr.rel (%p1437_p12) target bundleno = 381 (0x17d), region = 28  ;;  %p1438_p1 = scmp.eq.s32.totalorder (!%p1437_p12), %s1178_s13, 0 }
  0x51   : > { %1109 = dma.done.wait (%p1438_p1), [#allocation3], 256   ;;  %p1439_p8 = pmov %p1438_p1 }
  0x52   : > { %s1297_s6 = sand.u32 1, %s1126_s10   ;;  %p1440_p11 = scmp.ne.s32.totalorder %s1429_s20, 0 }
  0x53   : > { %1111 = vsyncadd (%p1439_p8), [#allocation3], 4294967040  ;;  %s767_s25 = sshll.u32 %s1297_s6, 9  ;;  %s151_s29 = scalar_lea.sflag [#allocation6], %s1297_s6 }
  0x54   : > { %s1301_s7 = scalar_lea.vmem [#allocation5], %s767_s25 }
  0x55   : > { %1113 = dma.done.wait (%p1440_p11), %s151_s29, 8192  }
  0x56   : > { %1115 = vsyncadd (%p1440_p11), %s151_s29, 4294959104  ;;  %v906_v0 = vld [vmem:[%s1301_s7 + $0x4] ss:$8 sps:$4 sm:$0xff]   ;;  %v910_v2 = vld [vmem:[%s1301_s7] ss:$8 sps:$4 sm:$0xff]   ;;  %s768_s20 = sshll.u32 %s1297_s6, 4 }
  0x57   : > { %v908_v1 = vld [vmem:[%s1301_s7 + $0x104] ss:$8 sps:$4 sm:$0xff]   ;;  %577 = vmatprep.subr.bf16.mxu1 %v906_v0  ;;  %v911_v3 = vld [vmem:[%s1301_s7 + $0x100] ss:$8 sps:$4 sm:$0xff]   ;;  %v912_v4 = vld [vmem:[%s1301_s7 + $0x14] ss:$8 sps:$4 sm:$0xff]  }
  0x58   : > { %618 = vmatprep.subr.bf16.mxu0 %v908_v1  ;;  %578 = vmatpush1.bf16.msra.mxu1 %v910_v2  ;;  %v914_v5 = vld [vmem:[%s1301_s7 + $0x114] ss:$8 sps:$4 sm:$0xff]   ;;  %v916_v6 = vld [vmem:[%s1301_s7 + $0x10] ss:$8 sps:$4 sm:$0xff]   ;;  %v918_v8 = vld [vmem:[%s1301_s7 + $0x24] ss:$8 sps:$4 sm:$0xff]  }
  0x59   : > { %619 = vmatpush1.bf16.msra.mxu0 %v911_v3  ;;  %579 = vmatprep.subr.bf16.mxu1 %v912_v4  ;;  %v917_v7 = vld [vmem:[%s1301_s7 + $0x110] ss:$8 sps:$4 sm:$0xff]   ;;  %v920_v9 = vld [vmem:[%s1301_s7 + $0x124] ss:$8 sps:$4 sm:$0xff]   ;;  %v922_v10 = vld [vmem:[%s1301_s7 + $0x20] ss:$8 sps:$4 sm:$0xff]  }
  0x5a   : > { %620 = vmatprep.subr.bf16.mxu0 %v914_v5  ;;  %v923_v11 = vld [vmem:[%s1301_s7 + $0x120] ss:$8 sps:$4 sm:$0xff]   ;;  %v924_v12 = vld [vmem:[%s1301_s7 + $0x34] ss:$8 sps:$4 sm:$0xff]   ;;  %v928_v14 = vld [vmem:[%s1301_s7 + $0x30] ss:$8 sps:$4 sm:$0xff]  }
  0x5b   : > { %v926_v13 = vld [vmem:[%s1301_s7 + $0x134] ss:$8 sps:$4 sm:$0xff]   ;;  %v929_v15 = vld [vmem:[%s1301_s7 + $0x130] ss:$8 sps:$4 sm:$0xff]   ;;  %v930_v16 = vld [vmem:[%s1301_s7 + $0x44] ss:$8 sps:$4 sm:$0xff]  }
  0x5c   : > { %580 = vmatpush1.bf16.msra.mxu1 %v916_v6  ;;  %v932_v17 = vld [vmem:[%s1301_s7 + $0x144] ss:$8 sps:$4 sm:$0xff]   ;;  %v934_v18 = vld [vmem:[%s1301_s7 + $0x40] ss:$8 sps:$4 sm:$0xff]   ;;  %v936_v20 = vld [vmem:[%s1301_s7 + $0x54] ss:$8 sps:$4 sm:$0xff]  }
  0x5d   : > { %621 = vmatpush1.bf16.msra.mxu0 %v917_v7  ;;  %581 = vmatprep.subr.bf16.mxu1 %v918_v8  ;;  %v935_v19 = vld [vmem:[%s1301_s7 + $0x140] ss:$8 sps:$4 sm:$0xff]   ;;  %v938_v21 = vld [vmem:[%s1301_s7 + $0x154] ss:$8 sps:$4 sm:$0xff]   ;;  %v940_v22 = vld [vmem:[%s1301_s7 + $0x50] ss:$8 sps:$4 sm:$0xff]  }
  0x5e   : > { %622 = vmatprep.subr.bf16.mxu0 %v920_v9  ;;  %v941_v23 = vld [vmem:[%s1301_s7 + $0x150] ss:$8 sps:$4 sm:$0xff]   ;;  %v942_v24 = vld [vmem:[%s1301_s7 + $0x64] ss:$8 sps:$4 sm:$0xff]   ;;  %v946_v26 = vld [vmem:[%s1301_s7 + $0x60] ss:$8 sps:$4 sm:$0xff]  }
  0x5f   : > { %v944_v25 = vld [vmem:[%s1301_s7 + $0x164] ss:$8 sps:$4 sm:$0xff]   ;;  %v947_v27 = vld [vmem:[%s1301_s7 + $0x160] ss:$8 sps:$4 sm:$0xff]   ;;  %v948_v28 = vld [vmem:[%s1301_s7 + $0x74] ss:$8 sps:$4 sm:$0xff]  }
  0x60   : > { %582 = vmatpush1.bf16.msra.mxu1 %v922_v10  ;;  %v950_v29 = vld [vmem:[%s1301_s7 + $0x174] ss:$8 sps:$4 sm:$0xff]   ;;  %v952_v30 = vld [vmem:[%s1301_s7 + $0x70] ss:$8 sps:$4 sm:$0xff]   ;;  %v954_v32 = vld [vmem:[%s1301_s7 + $0x84] ss:$8 sps:$4 sm:$0xff]  }
  0x61   : > { %623 = vmatpush1.bf16.msra.mxu0 %v923_v11  ;;  %583 = vmatprep.subr.bf16.mxu1 %v924_v12  ;;  %v953_v31 = vld [vmem:[%s1301_s7 + $0x170] ss:$8 sps:$4 sm:$0xff]   ;;  %v956_v33 = vld [vmem:[%s1301_s7 + $0x184] ss:$8 sps:$4 sm:$0xff]   ;;  %v958_v34 = vld [vmem:[%s1301_s7 + $0x80] ss:$8 sps:$4 sm:$0xff]  }
  0x62   : > { %624 = vmatprep.subr.bf16.mxu0 %v926_v13  ;;  %v959_v35 = vld [vmem:[%s1301_s7 + $0x180] ss:$8 sps:$4 sm:$0xff]   ;;  %v960_v36 = vld [vmem:[%s1301_s7 + $0x94] ss:$8 sps:$4 sm:$0xff]   ;;  %v964_v38 = vld [vmem:[%s1301_s7 + $0x90] ss:$8 sps:$4 sm:$0xff]  }
  0x63   : > { %v962_v37 = vld [vmem:[%s1301_s7 + $0x194] ss:$8 sps:$4 sm:$0xff]   ;;  %v965_v39 = vld [vmem:[%s1301_s7 + $0x190] ss:$8 sps:$4 sm:$0xff]   ;;  %v966_v40 = vld [vmem:[%s1301_s7 + $0xa4] ss:$8 sps:$4 sm:$0xff]  }
  0x64   : > { %584 = vmatpush1.bf16.msra.mxu1 %v928_v14  ;;  %v968_v41 = vld [vmem:[%s1301_s7 + $0x1a4] ss:$8 sps:$4 sm:$0xff]   ;;  %v970_v42 = vld [vmem:[%s1301_s7 + $0xa0] ss:$8 sps:$4 sm:$0xff]   ;;  %v972_v44 = vld [vmem:[%s1301_s7 + $0xb4] ss:$8 sps:$4 sm:$0xff]  }
  0x65   : > { %625 = vmatpush1.bf16.msra.mxu0 %v929_v15  ;;  %585 = vmatprep.subr.bf16.mxu1 %v930_v16  ;;  %v971_v43 = vld [vmem:[%s1301_s7 + $0x1a0] ss:$8 sps:$4 sm:$0xff]   ;;  %v974_v45 = vld [vmem:[%s1301_s7 + $0x1b4] ss:$8 sps:$4 sm:$0xff]   ;;  %v976_v49 = vld [vmem:[%s1301_s7 + $0xb0] ss:$8 sps:$4 sm:$0xff]  }
  0x66   : > { %626 = vmatprep.subr.bf16.mxu0 %v932_v17  ;;  %v177_v46 = vld [vmem:[#allocation2] sm:$0xff]  ;;  %v178_v48 = vld [vmem:[#allocation2 + $0x8] sm:$0xff]  ;;  %v978_v52 = vld [vmem:[%s1301_s7 + $0xc4] ss:$8 sps:$4 sm:$0xff]   ;;  %s843_s23 = sshll.u32 %s1178_s13, 8  ;;  %s174_s28 = scalar_lea.vmem [#allocation7], %s768_s20 }
  0x67   : > { %v770_v47 = vcombine.high %v177_v46, %v177_v46  ;;  %v977_v50 = vld [vmem:[%s1301_s7 + $0x1b0] ss:$8 sps:$4 sm:$0xff]   ;;  %v772_v51 = vcombine.high %v178_v48, %v178_v48  ;;  %v980_v53 = vld [vmem:[%s1301_s7 + $0x1c4] ss:$8 sps:$4 sm:$0xff]   ;;  %v982_v54 = vld [vmem:[%s1301_s7 + $0xc0] ss:$8 sps:$4 sm:$0xff]   ;;  %v769_v4 = vcombine.low %v177_v46, %v177_v46  ;;  %v771_v5 = vcombine.low %v178_v48, %v178_v48  ;;  %s1376_s8 = scalar_lea.hbm %s1422_s2, %s843_s23 }
  0x68   : > { %586 = vmatpush1.bf16.msra.mxu1 %v934_v18  ;;  %v983_v55 = vld [vmem:[%s1301_s7 + $0x1c0] ss:$8 sps:$4 sm:$0xff]   ;;  %v984_v56 = vld [vmem:[%s1301_s7 + $0xd4] ss:$8 sps:$4 sm:$0xff]   ;;  %v988_v58 = vld [vmem:[%s1301_s7 + $0xd0] ss:$8 sps:$4 sm:$0xff]  }
  0x69   : > { %627 = vmatpush1.bf16.msra.mxu0 %v935_v19  ;;  %587 = vmatprep.subr.bf16.mxu1 %v936_v20  ;;  %v986_v57 = vld [vmem:[%s1301_s7 + $0x1d4] ss:$8 sps:$4 sm:$0xff]   ;;  %v989_v59 = vld [vmem:[%s1301_s7 + $0x1d0] ss:$8 sps:$4 sm:$0xff]   ;;  %v990_v60 = vld [vmem:[%s1301_s7 + $0xe4] ss:$8 sps:$4 sm:$0xff]  }
  0x6a   : > { %628 = vmatprep.subr.bf16.mxu0 %v938_v21  ;;  %609 = vmatprep.mubr.bf16.mxu1 %v770_v47  ;;  %v992_v61 = vld [vmem:[%s1301_s7 + $0x1e4] ss:$8 sps:$4 sm:$0xff]   ;;  %v994_v62 = vld [vmem:[%s1301_s7 + $0xe0] ss:$8 sps:$4 sm:$0xff]   ;;  %v996_v0 = vld [vmem:[%s1301_s7 + $0xf4] ss:$8 sps:$4 sm:$0xff]  }
  0x6b   : > { %650 = vmatprep.mubr.bf16.mxu0 %v772_v51  ;;  %v995_v63 = vld [vmem:[%s1301_s7 + $0x1e0] ss:$8 sps:$4 sm:$0xff]   ;;  %v998_v1 = vld [vmem:[%s1301_s7 + $0x1f4] ss:$8 sps:$4 sm:$0xff]   ;;  %v1000_v2 = vld [vmem:[%s1301_s7 + $0xf0] ss:$8 sps:$4 sm:$0xff]  }
  0x6c   : > { %588 = vmatpush1.bf16.msra.mxu1 %v940_v22  ;;  %v1001_v3 = vld [vmem:[%s1301_s7 + $0x1f0] ss:$8 sps:$4 sm:$0xff]   ;;  %s676_s30 = sshll.u32 %s174_s28, 4  ;;  %s662_s13 = scalar_lea.sflag [#allocation4], %s1297_s6  ;;  %s1378_s30 = int_to_ptr.vmem [resolvable:$true] %s676_s30 }
  0x6d   : > { %629 = vmatpush1.bf16.msra.mxu0 %v941_v23  ;;  %589 = vmatprep.subr.bf16.mxu1 %v942_v24  ;;  %s1064_s14 = scalar_lea.vmem %s1378_s30, 256  ;;  %p1441_p10 = scmp.ne.s32.totalorder %s1430_s21, 0 }
  0x6e   : > { %630 = vmatprep.subr.bf16.mxu0 %v944_v25  ;;  %p1065_p9 = scmp.ne.s32.totalorder %s1378_s30, %s1064_s14  ;;  %s1141_s27 = smov [#allocation7]  }
  0x6f   : > { %s1068_s16 = sshll.u32 %s1141_s27, 4  ;;  %s1069_s16 = int_to_ptr.vmem [resolvable:$false] %s1068_s16 }
  0x70   : > { %590 = vmatpush1.bf16.msra.mxu1 %v946_v26  ;;  %p1066_p2 = pnand %p1065_p9, %p1441_p10  ;;  %s1070_s17 = scalar_lea.vmem %s1069_s16, 512 }
  0x71   : > { %631 = vmatpush1.bf16.msra.mxu0 %v947_v27  ;;  %591 = vmatprep.subr.bf16.mxu1 %v948_v28  ;;  %p1071_p5 = scmp.lt.s32.totalorder %s1378_s30, %s1069_s16  ;;  %p1072_p0 = scmp.lt.s32.totalorder %s1070_s17, %s1064_s14 }
  0x72   : > { %632 = vmatprep.subr.bf16.mxu0 %v950_v29  ;;  %p1067_p4 = pneg %p1066_p2 }
  0x73   : > { %p1073_p6 = por %p1072_p0, %p1071_p5 }
  0x74   : > { %592 = vmatpush1.bf16.msra.mxu1 %v952_v30 }
  0x75   : > { %633 = vmatpush1.bf16.msra.mxu0 %v953_v31  ;;  %593 = vmatprep.subr.bf16.mxu1 %v954_v32  ;;  %p1074_p13 = pnand %p1073_p6, %p1067_p4 }
  0x76   : > { %634 = vmatprep.subr.bf16.mxu0 %v956_v33 }
  0x78   : > { %594 = vmatpush1.bf16.msra.mxu1 %v958_v34 }
  0x79   : > { %635 = vmatpush1.bf16.msra.mxu0 %v959_v35  ;;  %595 = vmatprep.subr.bf16.mxu1 %v960_v36 }
  0x7a   : > { %636 = vmatprep.subr.bf16.mxu0 %v962_v37 }
  0x7c   : > { %596 = vmatpush1.bf16.msra.mxu1 %v964_v38 }
  0x7d   : > { %637 = vmatpush1.bf16.msra.mxu0 %v965_v39  ;;  %597 = vmatprep.subr.bf16.mxu1 %v966_v40 }
  0x7e   : > { %638 = vmatprep.subr.bf16.mxu0 %v968_v41 }
  0x80   : > { %598 = vmatpush1.bf16.msra.mxu1 %v970_v42 }
  0x81   : > { %639 = vmatpush1.bf16.msra.mxu0 %v971_v43  ;;  %599 = vmatprep.subr.bf16.mxu1 %v972_v44 }
  0x82   : > { %640 = vmatprep.subr.bf16.mxu0 %v974_v45 }
  0x84   : > { %600 = vmatpush1.bf16.msra.mxu1 %v976_v49 }
  0x85   : > { %641 = vmatpush1.bf16.msra.mxu0 %v977_v50  ;;  %601 = vmatprep.subr.bf16.mxu1 %v978_v52 }
  0x86   : > { %642 = vmatprep.subr.bf16.mxu0 %v980_v53 }
  0x88   : > { %602 = vmatpush1.bf16.msra.mxu1 %v982_v54 }
  0x89   : > { %643 = vmatpush1.bf16.msra.mxu0 %v983_v55  ;;  %603 = vmatprep.subr.bf16.mxu1 %v984_v56 }
  0x8a   : > { %644 = vmatprep.subr.bf16.mxu0 %v986_v57 }
  0x8c   : > { %604 = vmatpush1.bf16.msra.mxu1 %v988_v58 }
  0x8d   : > { %645 = vmatpush1.bf16.msra.mxu0 %v989_v59  ;;  %605 = vmatprep.subr.bf16.mxu1 %v990_v60 }
  0x8e   : > { %646 = vmatprep.subr.bf16.mxu0 %v992_v61 }
  0x90   : > { %606 = vmatpush1.bf16.msra.mxu1 %v994_v62 }
  0x91   : > { %647 = vmatpush1.bf16.msra.mxu0 %v995_v63  ;;  %607 = vmatprep.subr.bf16.mxu1 %v996_v0 }
  0x92   : > { %648 = vmatprep.subr.bf16.mxu0 %v998_v1 }
  0x94   : > { %608 = vmatpush1.bf16.msra.mxu1 %v1000_v2 }
  0x95   : > { %649 = vmatpush1.bf16.msra.mxu0 %v1001_v3 }
  0x97   : > { %610 = vmatmul.mubr.bf16.vlgmr.msra.gmra.mrb[0].mxu1 %v769_v4 }
  0x98   : > { %651 = vmatmul.mubr.bf16.vlgmr.msra.gmra.mrb[0].mxu0 %v771_v5 }
 0x16a   : > { %v611_v6 = vpop.f32.mrb[0].mxu1 }
 0x16b   : > { %v652_v7 = vpop.f32.mrb[0].mxu0  ;;  %v613_v9 = vpop.f32.mrb[1].mxu1 }
 0x16c   : > { %v653_v8 = vadd.f32 %v652_v7, %v611_v6  ;;  %v654_v10 = vpop.f32.mrb[1].mxu0  ;;  %v615_v12 = vpop.f32.mrb[2].mxu1 }
 0x16d   : > { %v655_v11 = vadd.f32 %v654_v10, %v613_v9  ;;  %v656_v13 = vpop.f32.mrb[2].mxu0  ;;  %v616_v14 = vpop.f32.mrb[3].mxu1 }
 0x16e   : > { %659 = vst [vmem:[%s174_s28] sm:$0xff] %v653_v8  ;;  %v657_v15 = vpop.f32.mrb[3].mxu0 }
 0x16f   : > { %660 = vst [vmem:[%s174_s28 + $0x8] sm:$0xff] %v655_v11 }
 0x170   : > { %1077 = shalt.err (!%p1074_p13)
}
 0x171   : > { %s1078_s19 = scalar_lea.hbm %s1376_s8, 256  ;;  %s1082_s4 = scalar_lea.hbm %s1422_s2, 512 }
 0x172   : > { %p1079_p7 = scmp.ne.s32.totalorder %s1376_s8, %s1078_s19  ;;  %p1083_p1 = scmp.lt.u32.totalorder %s1376_s8, %s1422_s2 }
 0x173   : > { %p1084_p8 = scmp.lt.u32.totalorder %s1082_s4, %s1078_s19  ;;  %p1086_p9 = scmp.lt.u32.totalorder %s1078_s19, %s1376_s8 }
 0x174   : > { %p1080_p3 = pnand %p1079_p7, %p1441_p10 }
 0x175   : > { %p1085_p11 = por %p1084_p8, %p1083_p1 }
 0x176   : > { %p1081_p12 = pneg %p1080_p3 }
 0x177   : > { %p1087_p2 = por %p1086_p9, %p1085_p11 }
 0x179   : > { %p1088_p4 = pnand %p1087_p2, %p1081_p12 }
 0x17b   : > { %1091 = shalt.err (!%p1088_p4)
}
 0x17c   : > { %852 = dma.vmem_to_hbm [thread:$0]  (%p1441_p10), %s1378_s30, 256, %s1376_s8, %s662_s13  }
 0x17d PF: > { %s688_s29 = sand.u32 1, %s1122_s9   ;;  %p1442_p5 = scmp.ne.s32.totalorder %s1431_s22, 0 }
 0x17e   : > { %p1443_p0 = scmp.ge.s32.totalorder %s1134_s12, 2  ;;  %s689_s7 = scalar_lea.sflag [#allocation4], %s688_s29 }
 0x180   : > { %p863_p6 = pnand %p1443_p0, %p1442_p5 }
 0x182   : > { %1117 = dma.done.wait (!%p863_p6), %s689_s7, 256  }
 0x183   : > { %1119 = vsyncadd (!%p863_p6), %s689_s7, 4294967040  ;;  %p16_p13 = scmp.ge.s32.totalorder %s1182_s15, 4   ;;  %s1444_s9 = smov %s1126_s10 }
 0x184   : > { %s1445_s10 = smov %s1130_s11  ;;  %s1446_s11 = smov %s1194_s18 }
 0x185   : > { %s1447_s12 = smov %s1182_s15  ;;  %18 = sbr.rel (!%p16_p13) target bundleno = 6 (0x6), region = 78 }
 0x18c   :  { %694 = vsyncpa [#allocation3], 1 }
 0x18d   :  { %696 = vsyncpa [#allocation3 + $0x1], 1 }
 0x18e   :  { %697 = vsyncpa [#allocation6], 1 }
 0x18f   :  { %699 = vsyncpa [#allocation6 + $0x1], 1 }
 0x190   :  { %700 = vsyncpa [#allocation4], 1 }
 0x191   :  { %702 = vsyncpa [#allocation4 + $0x1], 1 }

</bundles_post_ra>
